<compile_context>
chip_gen: v7x
topology: tpu7x:2x2x1
jax: 0.10.0
libtpu: 0.0.40
codegen_flags: <defaults>
</compile_context>

<pallas_src>
import functools

import jax
import jax.numpy as jnp
from jax.experimental import pallas as pl
from jax.experimental.pallas import tpu as pltpu


def _round_up(x, m):
    return (x + m - 1) // m * m


def _physical_vmem_bytes():
    try:
        return int(pltpu.get_tpu_info().vmem_capacity_bytes)
    except Exception:
        return 64 * 1024 * 1024  # conservative (v7x per-TensorCore)


def _pick_cout_tile(cout_p):
    """256-wide Cout tile on v6e/v7x (2x256 MXU), 128 on v5e (4x128 MXU)."""
    try:
        kind = jax.devices()[0].device_kind.lower()
    except Exception:
        kind = ""
    is_v5e = ("v5e" in kind) or ("v5 lite" in kind) or ("v5litepod" in kind)
    if (not is_v5e) and cout_p % 256 == 0:
        return 256
    return 128


def _vmem_needed(tH, KH, Wp, Wo_k, Cin_p, TC, ntap, out_itemsize):
    slab = (tH + KH - 1) * Wp * Cin_p * 2                 # bf16 halo slab scratch
    patch = tH * Wo_k * ntap * Cin_p * 2 if ntap > 1 else 0  # bf16 im2col patch scratch
    wblk = 2 * ntap * Cin_p * TC * 2                      # double-buffered bf16 weight tile
    oblk = 2 * tH * Wo_k * TC * out_itemsize              # double-buffered output tile
    ytmp = tH * Wo_k * TC * 4                             # f32 matmul result before the store
    return slab + patch + wblk + oblk + ytmp + (2 << 20)  # + slack


def _conv_bn_act_kernel(x_hbm, w_ref, scale_ref, bias_ref, o_ref, slab_ref, *rest,
                        KH, KW, tH, Wo_k, Cin_p, activation):
    """One (batch, H-tile, Cout-tile) grid step.

    x_hbm:     (N, Hp, Wp, Cin_p)        bf16 padded input, raw HBM ref (manual halo DMA)
    w_ref:     (KH*KW*Cin_p, TC)         bf16 tap-folded weights for this Cout tile
    scale_ref: (1, TC)                   f32 folded BN scale = gamma / sqrt(var + eps)
    bias_ref:  (1, TC)                   f32 folded BN bias  = beta - mean * scale
    o_ref:     (1, tH, Wo_k, TC)         output tile, stored directly in its final dtype
    slab_ref:  (tH+KH-1, Wp, Cin_p)      bf16 VMEM halo-row slab (persists across Cout tiles)
    patch_ref: (tH*Wo_k, KH*KW*Cin_p)    bf16 VMEM im2col patch   (only when KH*KW > 1)
    sem:       DMA semaphore
    """
    ntap = KH * KW
    if ntap > 1:
        patch_ref, sem = rest
    else:
        patch_ref = None
        (sem,) = rest

    b = pl.program_id(0)
    h = pl.program_id(1)
    c = pl.program_id(2)

    @pl.when(c == 0)
    def _stage_input():
        # Fetch the halo row slab for this (batch, H-tile) once; the Cout axis is
        # "arbitrary" (sequential), so the slab/patch scratch is reused for all Cout tiles.
        cp = pltpu.make_async_copy(
            x_hbm.at[b, pl.ds(h * tH, tH + KH - 1)], slab_ref, sem)
        cp.start()
        cp.wait()
        if ntap > 1:
            # im2col: fold every (kh, kw) tap into the contraction axis.  The sublane-shifted
            # slice + relayout happens once per (b, h) (not per Cout tile, not per tap-matmul).
            for kh in range(KH):
                for kw in range(KW):
                    t = kh * KW + kw
                    patch_ref[:, t * Cin_p:(t + 1) * Cin_p] = (
                        slab_ref[kh:kh + tH, kw:kw + Wo_k, :]
                        .reshape(tH * Wo_k, Cin_p))

    if ntap > 1:
        patch = patch_ref[...]
    else:
        # 1x1 (or wrapper-folded) conv: the slab IS the patch.
        patch = slab_ref[...].reshape(tH * Wo_k, Cin_p)

    # One long MXU contraction per Cout tile -> no f32 accumulator read-modify-write.
    y = jnp.dot(patch, w_ref[...], preferred_element_type=jnp.float32)
    y = y * scale_ref[...] + bias_ref[...]                 # fused eval-mode BatchNorm
    if activation == "relu":
        y = jnp.maximum(y, 0.0)
    elif activation == "swish":
        y = y * jax.nn.sigmoid(y)
    o_ref[...] = y.reshape(1, tH, Wo_k, y.shape[-1]).astype(o_ref.dtype)


def conv_norm_layer(x_nchw, weight_oihw, gamma, beta, running_mean, running_var,
                    *, stride=1, padding=None, groups=1, eps=1e-5, activation=None,
                    compute_dtype=jnp.bfloat16, out_dtype=None, tile_h=None):
    """ConvNormLayer forward: conv(no bias) -> BatchNorm(eval) -> optional relu/swish.

    Takes / returns NCHW (PyTorch convention).  Pass out_dtype=jnp.bfloat16 to halve the
    output HBM writeback and the output VMEM double buffer.
    """
    if activation not in (None, "relu", "swish"):
        raise ValueError(f"Unsupported activation: {activation}")
    if stride != 1:
        raise NotImplementedError("stride > 1 not implemented")  # TODO(synk): strided conv
    if groups != 1:
        raise NotImplementedError("groups > 1 not implemented")  # TODO(synk): grouped conv

    Cout, Cin_w, KH, KW = weight_oihw.shape
    N, Cin, H, W = x_nchw.shape
    assert Cin == Cin_w
    if padding is None:
        padding = (KH - 1) // 2          # matches the PyTorch module (assumes square kernel)
    out_dtype = x_nchw.dtype if out_dtype is None else out_dtype
    out_itemsize = jnp.dtype(out_dtype).itemsize

    Ho = H + 2 * padding - KH + 1
    Wo = W + 2 * padding - KW + 1
    assert Ho > 0 and Wo > 0

    # NCHW -> NHWC (channels on the 128-lane axis), bf16 for the MXU.
    x = jnp.transpose(x_nchw, (0, 2, 3, 1)).astype(compute_dtype)
    w = jnp.transpose(weight_oihw, (2, 3, 1, 0)).astype(compute_dtype)   # HWIO

    # Small-Cin layers (stem): fold the KH*KW taps into the channel axis in the wrapper so
    # the MXU contraction has KH*KW*Cin real columns instead of a 128-padded Cin per tap.
    if KH * KW > 1 and Cin * KH * KW <= 128:
        x_sp = jnp.pad(x, ((0, 0), (padding, padding), (padding, padding), (0, 0)))
        cols = [x_sp[:, kh:kh + Ho, kw:kw + Wo, :]
                for kh in range(KH) for kw in range(KW)]
        x_eff = jnp.concatenate(cols, axis=-1)             # (N, Ho, Wo, KH*KW*Cin)
        w_eff = w.reshape(1, 1, KH * KW * Cin, Cout)
        KHe, KWe, pad_e = 1, 1, 0
    else:
        x_eff, w_eff, KHe, KWe, pad_e = x, w, KH, KW, padding

    ntap = KHe * KWe
    _, He, We, Ce = x_eff.shape
    Cin_p = _round_up(Ce, 128)                 # contraction channels on lanes
    Cout_p = _round_up(Cout, 128)              # output channels on lanes
    TC = _pick_cout_tile(Cout_p)               # 128 on v5e, 256 on v6e/v7x when possible
    n_ct = Cout_p // TC
    Wo_k = _round_up(Wo, 8)                    # lane-group/sublane-clean output width
    Wp = Wo_k + KWe - 1                        # slab width incl. W halo

    # Pick the H tile from the actual block sizes and the chip's physical VMEM.
    phys_vmem = _physical_vmem_bytes()
    budget = min(int(phys_vmem * 0.7), 96 * 1024 * 1024)
    if tile_h is None:
        cands = sorted({t for t in (256, 128, 64, 32, 16, 8, 4, 2, 1) if t <= Ho} | {Ho},
                       reverse=True)
        tH = cands[-1]
        for t in cands:
            if _vmem_needed(t, KHe, Wp, Wo_k, Cin_p, TC, ntap, out_itemsize) <= budget:
                tH = t
                break
    else:
        tH = max(1, min(int(tile_h), Ho))
    n_ht = pl.cdiv(Ho, tH)
    Ho_k = n_ht * tH
    Hp = Ho_k + KHe - 1

    # Pad input: spatial padding + tile/lane padding (zeros contribute nothing).
    pads_x = ((0, 0), (pad_e, Hp - He - pad_e), (pad_e, Wp - We - pad_e), (0, Cin_p - Ce))
    if any(p != (0, 0) for p in pads_x):
        x_k = jnp.pad(x_eff, pads_x)
    else:
        x_k = x_eff

    # Tap-folded weights: (KHe, KWe, Cin_p, Cout_p) -> (KHe*KWe*Cin_p, Cout_p).
    w_k = jnp.pad(w_eff, ((0, 0), (0, 0), (0, Cin_p - Ce), (0, Cout_p - Cout)))
    w_k = w_k.reshape(ntap * Cin_p, Cout_p)

    # Fold eval-mode BatchNorm into per-channel scale/bias (f32).
    scale = gamma.astype(jnp.float32) / jnp.sqrt(running_var.astype(jnp.float32) + eps)
    bias = beta.astype(jnp.float32) - running_mean.astype(jnp.float32) * scale
    scale = jnp.pad(scale, (0, Cout_p - Cout)).reshape(1, Cout_p)
    bias = jnp.pad(bias, (0, Cout_p - Cout)).reshape(1, Cout_p)

    kernel = functools.partial(
        _conv_bn_act_kernel,
        KH=KHe, KW=KWe, tH=tH, Wo_k=Wo_k, Cin_p=Cin_p, activation=activation)

    scratch = [pltpu.VMEM((tH + KHe - 1, Wp, Cin_p), compute_dtype)]   # halo slab
    if ntap > 1:
        scratch.append(pltpu.VMEM((tH * Wo_k, ntap * Cin_p), compute_dtype))  # im2col patch
    scratch.append(pltpu.SemaphoreType.DMA(()))

    needed = _vmem_needed(tH, KHe, Wp, Wo_k, Cin_p, TC, ntap, out_itemsize)
    vmem_limit = int(min(max(needed * 1.25, 32 * 1024 * 1024), phys_vmem * 0.85))

    flops = 2 * N * Ho_k * Wo_k * ntap * Cin_p * Cout_p
    transcendentals = N * Ho_k * Wo_k * Cout_p if activation == "swish" else 0
    bytes_accessed = (x_k.size * x_k.dtype.itemsize
                      + N * n_ht * w_k.size * w_k.dtype.itemsize
                      + scale.size * 4 + bias.size * 4
                      + N * Ho_k * Wo_k * Cout_p * out_itemsize)

    out_nhwc = pl.pallas_call(
        kernel,
        out_shape=jax.ShapeDtypeStruct((N, Ho_k, Wo_k, Cout_p), out_dtype),
        grid_spec=pltpu.PrefetchScalarGridSpec(
            num_scalar_prefetch=0,
            grid=(N, n_ht, n_ct),                         # Cout tiles innermost (sequential)
            in_specs=[
                pl.BlockSpec(memory_space=pl.ANY),        # raw HBM; halo rows DMA'd manually
                pl.BlockSpec((ntap * Cin_p, TC), lambda b, h, c: (0, c)),
                pl.BlockSpec((1, TC), lambda b, h, c: (0, c)),
                pl.BlockSpec((1, TC), lambda b, h, c: (0, c)),
            ],
            out_specs=pl.BlockSpec((1, tH, Wo_k, TC), lambda b, h, c: (b, h, 0, c)),
            scratch_shapes=scratch,
        ),
        compiler_params=pltpu.CompilerParams(
            # batch / H-tiles shard across TensorCores; Cout axis stays sequential so the
            # staged slab/patch scratch is reused (and the input is not fetched per core).
            dimension_semantics=("parallel", "parallel", "arbitrary"),
            vmem_limit_bytes=vmem_limit,
        ),
        cost_estimate=pl.CostEstimate(flops=flops, transcendentals=transcendentals,
                                      bytes_accessed=bytes_accessed),
    )(x_k, w_k, scale, bias)

    out = out_nhwc
    if (Ho_k, Wo_k, Cout_p) != (Ho, Wo, Cout):
        out = out[:, :Ho, :Wo, :Cout]
    # NHWC -> NCHW to match the PyTorch output convention.
    return jnp.transpose(out, (0, 3, 1, 2))


def _reference(x, weight, gamma, beta, mean, var, *, padding, eps=1e-5, activation=None):
    """Pure-JAX reference (same bf16 input rounding as the kernel, f32 accumulation)."""
    xb = x.astype(jnp.bfloat16).astype(jnp.float32)
    wb = weight.astype(jnp.bfloat16).astype(jnp.float32)
    x_nhwc = jnp.transpose(xb, (0, 2, 3, 1))
    w_hwio = jnp.transpose(wb, (2, 3, 1, 0))
    y = jax.lax.conv_general_dilated(
        x_nhwc, w_hwio, window_strides=(1, 1),
        padding=((padding, padding), (padding, padding)),
        dimension_numbers=("NHWC", "HWIO", "NHWC"),
        precision=jax.lax.Precision.HIGHEST)
    y = (y - mean) / jnp.sqrt(var + eps) * gamma + beta
    if activation == "relu":
        y = jnp.maximum(y, 0.0)
    elif activation == "swish":
        y = y * jax.nn.sigmoid(y)
    return jnp.transpose(y, (0, 3, 1, 2))


def _make_params(key, N, Cin, H, W, Cout, K):
    kx, kw, kg, kb, km, kv = jax.random.split(key, 6)
    x = jax.random.normal(kx, (N, Cin, H, W), jnp.float32)
    weight = jax.random.normal(kw, (Cout, Cin, K, K), jnp.float32) * 0.1
    gamma = 1.0 + 0.1 * jax.random.normal(kg, (Cout,), jnp.float32)
    beta = 0.1 * jax.random.normal(kb, (Cout,), jnp.float32)
    mean = 0.1 * jax.random.normal(km, (Cout,), jnp.float32)
    var = 1.0 + 0.1 * jnp.abs(jax.random.normal(kv, (Cout,), jnp.float32))
    return x, weight, gamma, beta, mean, var


if __name__ == "__main__":
    key = jax.random.PRNGKey(0)
    k1, k2 = jax.random.split(key, 2)

    # Test 1: ConvNormLayer(in=4, out=8, kernel_size=3, activation='relu') — exercises the
    # small-Cin wrapper tap-folding path (contraction = 9*4 real columns, f32 output).
    x, wgt, g, b, m, v = _make_params(k1, N=2, Cin=4, H=16, W=16, Cout=8, K=3)
    out1 = conv_norm_layer(x, wgt, g, b, m, v, stride=1, activation="relu")
    out1 = jax.block_until_ready(out1)
    ref1 = _reference(x, wgt, g, b, m, v, padding=1, activation="relu")
    assert out1.shape == (2, 8, 16, 16) and out1.dtype == x.dtype
    err1 = float(jnp.max(jnp.abs(out1 - ref1)))
    assert jnp.allclose(out1, ref1, atol=2e-3, rtol=2e-3), err1

    # Test 2: larger Cin -> in-kernel im2col path, H tiled (tile_h=8) with halo DMA, awkward
    # spatial sizes (padded W / H tiles), swish activation, bf16 output storage.
    x2, wgt2, g2, b2, m2, v2 = _make_params(k2, N=1, Cin=32, H=20, W=18, Cout=24, K=3)
    out2 = conv_norm_layer(x2, wgt2, g2, b2, m2, v2, stride=1, activation="swish",
                           out_dtype=jnp.bfloat16, tile_h=8)
    out2 = jax.block_until_ready(out2)
    ref2 = _reference(x2, wgt2, g2, b2, m2, v2, padding=1, activation="swish")
    assert out2.shape == (1, 24, 20, 18) and out2.dtype == jnp.bfloat16
    out2_f = out2.astype(jnp.float32)
    err2 = float(jnp.max(jnp.abs(out2_f - ref2)))
    assert jnp.allclose(out2_f, ref2, atol=5e-2, rtol=5e-2), err2

    print("KERNEL_OK")
</pallas_src>

<mosaic_0001>
module attributes {stable_mosaic.version = 11 : i64} {
  func.func @_conv_bn_act_kernel(%arg0: i32, %arg1: i32, %arg2: i32, %arg3: memref<2x16x16x128xbf16, #tpu.memory_space<any>>, %arg4: memref<128x128xbf16, #tpu.memory_space<vmem>>, %arg5: memref<1x128xf32, #tpu.memory_space<vmem>>, %arg6: memref<1x128xf32, #tpu.memory_space<vmem>>, %arg7: memref<1x16x16x128xf32, #tpu.memory_space<vmem>>, %arg8: memref<16x16x128xbf16, #tpu.memory_space<vmem>>, %arg9: memref<!tpu.dma_semaphore, #tpu.memory_space<semaphore_mem>>) attributes {dimension_semantics = [#tpu.dimension_semantics<parallel>, #tpu.dimension_semantics<parallel>, #tpu.dimension_semantics<arbitrary>], iteration_bounds = array<i64: 2, 1, 1>, scalar_prefetch = 0 : i64, scratch_operands = 2 : i64, tpu.core_type = #tpu.core_type<tc>, window_params = [{}, {transform_indices = @transform_1, window_bounds = array<i64: 128, 128>}, {transform_indices = @transform_2, window_bounds = array<i64: 1, 128>}, {transform_indices = @transform_3, window_bounds = array<i64: 1, 128>}, {transform_indices = @transform_4, window_bounds = array<i64: 1, 16, 16, 128>}]} {
    %c0_i32 = arith.constant 0 : i32
    %0 = arith.cmpi eq, %arg2, %c0_i32 : i32
    %1 = arith.extui %0 : i1 to i32
    %c0_i32_0 = arith.constant 0 : i32
    %2 = arith.cmpi ne, %1, %c0_i32_0 : i32
    scf.if %2 {
      %c16_i32 = arith.constant 16 : i32
      %17 = arith.muli %arg1, %c16_i32 : i32
      %c0_i32_14 = arith.constant 0 : i32
      %c0_i32_15 = arith.constant 0 : i32
      %18 = tpu.memref_slice %arg3[%arg0, %17, %c0_i32_14, %c0_i32_15] : memref<2x16x16x128xbf16, #tpu.memory_space<any>> -> memref<1x16x16x128xbf16, #tpu.memory_space<any>>
      %19 = tpu.memref_squeeze %18 : memref<1x16x16x128xbf16, #tpu.memory_space<any>> -> memref<16x16x128xbf16, #tpu.memory_space<any>>
      tpu.enqueue_dma source(%19 : memref<16x16x128xbf16, #tpu.memory_space<any>>) target(%arg8 : memref<16x16x128xbf16, #tpu.memory_space<vmem>>) target_semaphore(%arg9 : memref<!tpu.dma_semaphore, #tpu.memory_space<semaphore_mem>>)
      %c0_i32_16 = arith.constant 0 : i32
      %c0_i32_17 = arith.constant 0 : i32
      %20 = tpu.memref_slice %arg3[%arg0, %17, %c0_i32_16, %c0_i32_17] : memref<2x16x16x128xbf16, #tpu.memory_space<any>> -> memref<1x16x16x128xbf16, #tpu.memory_space<any>>
      %21 = tpu.memref_squeeze %20 : memref<1x16x16x128xbf16, #tpu.memory_space<any>> -> memref<16x16x128xbf16, #tpu.memory_space<any>>
      tpu.wait_dma2 semaphore(%arg9 : memref<!tpu.dma_semaphore, #tpu.memory_space<semaphore_mem>>) src(%21 : memref<16x16x128xbf16, #tpu.memory_space<any>>) dst(%arg8 : memref<16x16x128xbf16, #tpu.memory_space<vmem>>)
    } else {
    }
    %c0 = arith.constant 0 : index
    %c0_1 = arith.constant 0 : index
    %c0_2 = arith.constant 0 : index
    %3 = vector.load %arg8[%c0, %c0_1, %c0_2] : memref<16x16x128xbf16, #tpu.memory_space<vmem>>, vector<16x16x128xbf16>
    %4 = vector.shape_cast %3 : vector<16x16x128xbf16> to vector<256x128xbf16>
    %c0_3 = arith.constant 0 : index
    %c0_4 = arith.constant 0 : index
    %5 = vector.load %arg4[%c0_3, %c0_4] : memref<128x128xbf16, #tpu.memory_space<vmem>>, vector<128x128xbf16>
    %cst = arith.constant dense<0.000000e+00> : vector<256x128xf32>
    %6 = tpu.matmul %4, %5, %cst {dimension_numbers = #tpu.dot_dimension_numbers<[1], [0], [0], [1], [0, 0, 1, 1], [], []>} : vector<256x128xbf16>, vector<128x128xbf16>, vector<256x128xf32> -> vector<256x128xf32>
    %c0_5 = arith.constant 0 : index
    %c0_6 = arith.constant 0 : index
    %7 = vector.load %arg5[%c0_5, %c0_6] : memref<1x128xf32, #tpu.memory_space<vmem>>, vector<1x128xf32>
    %8 = vector.broadcast %7 : vector<1x128xf32> to vector<256x128xf32>
    %9 = arith.mulf %6, %8 : vector<256x128xf32>
    %c0_7 = arith.constant 0 : index
    %c0_8 = arith.constant 0 : index
    %10 = vector.load %arg6[%c0_7, %c0_8] : memref<1x128xf32, #tpu.memory_space<vmem>>, vector<1x128xf32>
    %11 = vector.broadcast %10 : vector<1x128xf32> to vector<256x128xf32>
    %12 = arith.addf %9, %11 : vector<256x128xf32>
    %cst_9 = arith.constant 0.000000e+00 : f32
    %13 = vector.broadcast %cst_9 : f32 to vector<256x128xf32>
    %14 = arith.maximumf %12, %13 : vector<256x128xf32>
    %15 = vector.shape_cast %14 : vector<256x128xf32> to vector<1x16x16x128xf32>
    %c0_10 = arith.constant 0 : index
    %c0_11 = arith.constant 0 : index
    %c0_12 = arith.constant 0 : index
    %c0_13 = arith.constant 0 : index
    %16 = vector.load %arg7[%c0_10, %c0_11, %c0_12, %c0_13] : memref<1x16x16x128xf32, #tpu.memory_space<vmem>>, vector<1x16x16x128xf32>
    tpu.vector_store %arg7[%c0_10, %c0_11, %c0_12, %c0_13], %15 {strides = array<i32>} : memref<1x16x16x128xf32, #tpu.memory_space<vmem>>, vector<1x16x16x128xf32>,
    return
  }
  func.func @transform_1(%arg0: i32, %arg1: i32, %arg2: i32) -> (i32, i32) {
    %c0_i32 = arith.constant 0 : i32
    %c0_i32_0 = arith.constant 0 : i32
    return %c0_i32, %arg2 : i32, i32
  }
  func.func @transform_2(%arg0: i32, %arg1: i32, %arg2: i32) -> (i32, i32) {
    %c0_i32 = arith.constant 0 : i32
    %c0_i32_0 = arith.constant 0 : i32
    return %c0_i32, %arg2 : i32, i32
  }
  func.func @transform_3(%arg0: i32, %arg1: i32, %arg2: i32) -> (i32, i32) {
    %c0_i32 = arith.constant 0 : i32
    %c0_i32_0 = arith.constant 0 : i32
    return %c0_i32, %arg2 : i32, i32
  }
  func.func @transform_4(%arg0: i32, %arg1: i32, %arg2: i32) -> (i32, i32, i32, i32) {
    %c0_i32 = arith.constant 0 : i32
    %c0_i32_0 = arith.constant 0 : i32
    return %arg0, %arg1, %c0_i32, %arg2 : i32, i32, i32, i32
  }
}

</mosaic_0001>

<bundles_post_ra>
// kernel: tpu_custom_call.1
= control target key start
LH: loop header
LB: loop body
LE: loop exit
PB: predicated region body
PF: predicated region fallthrough
CT: control target
= control target key end

     0   :  { %9 = vsyncpa [#allocation5], 0  ;;  %s1403_s0 = inlined_call_operand.hbm [shape: bf16[2,16,16,128], index: 0, kind: input, shape index: {}]   ;;  %s1404_s1 = inlined_call_operand.hbm [shape: bf16[128,128], index: 1, kind: input, shape index: {}]   ;;  %s1405_s2 = inlined_call_operand.vmem [shape: f32[1,128], index: 2, kind: input, shape index: {}]   ;;  %s1406_s3 = inlined_call_operand.vmem [shape: f32[1,128], index: 3, kind: input, shape index: {}]   ;;  %s1407_s4 = inlined_call_operand.hbm [shape: f32[2,16,16,128], index: 4, kind: output, shape index: {}]  }
   0x1   :  { %10 = vsyncpa [#allocation6], 0 }
   0x2   :  { %12 = vsyncpa [#allocation6 + $0x1], 0  ;;  %s1132_s15 = smov 0   ;;  %s1134_s16 = smov 0  }
   0x3   :  { %s1136_s17 = smov 0   ;;  %s1138_s18 = smov 0  }
   0x4   :  { %s1140_s19 = smov 0   ;;  %s1142_s20 = smov 0  }
   0x5 LB: > { %s766_s21 = sadd.s32 4294967295, %s1098_s20   ;;  %s767_s22 = sadd.s32 4294967294, %s1098_s20   ;;  %s1098_s20 = sphi %s1142_s20, %s18_s20   ;;  %s1094_s19 = sphi %s1140_s19, %s1425_s19   ;;  %s1090_s18 = sphi %s1138_s18, %s1424_s18   ;;  %s1086_s17 = sphi %s1136_s17, %s1423_s17   ;;  %s1082_s16 = sphi %s1134_s16, %s1422_s16   ;;  %s1078_s15 = sphi %s1132_s15, %s1421_s15  }
   0x6   : > { %s37_s23 = sadd.s32 1, %s1094_s19  ;;  %s126_s24 = sadd.s32 1, %s1086_s17 }
   0x7   : > { %p39_p0 = scmp.ge.s32.totalorder %s37_s23, 2  ;;  %p136_p1 = scmp.ne.s32.totalorder %s1086_s17, %s1082_s16 }
   0x8   : > { %p137_p2 = scmp.eq.s32.totalorder %s766_s21, 1  ;;  %p142_p3 = scmp.ne.s32.totalorder %s1082_s16, %s1078_s15 }
   0x9   : > { %s1427_s23 = smov (%p39_p0, %s37_s23), 0  ;;  %p143_p5 = scmp.eq.s32.totalorder %s767_s22, 1 }
   0xa   : > { %p1172_p4 = por %p137_p2, %p136_p1  ;;  %s119_s26 = ssub.s32 %s1094_s19, %s1427_s23 }
   0xb   : > { %p768_p6 = scmp.ge.s32.totalorder %s1098_s20, 1  ;;  %p124_p7 = scmp.eq.s32.totalorder %s119_s26, 0 }
   0xc   : > { %s1412_s25 = scalar_select %p1172_p4, 1, 0 }
   0xd   : > { %p1179_p8 = por %p143_p5, %p142_p3  ;;  %p150_p9 = scmp.lt.s32.totalorder %s1098_s20, 3 }
   0xe   : > { %s1185_s28 = scalar_select %p124_p7, %s1086_s17, %s126_s24  }
   0xf   : > { %s1413_s27 = scalar_select %p1179_p8, 1, 0 }
  0x10   : > { %p1187_p10 = pnand %p768_p6, %p150_p9  ;;  %p1191_p11 = scmp.eq.s32.totalorder %s766_s21, 0 }
  0x11   : > { %s1100_s5 = smov [#allocation4]   ;;  %s962_s10 = scalar_lea.hbm %s1404_s1, 1024 }
  0x12   : > { %s1414_s29 = scalar_select %p1187_p10, 1, 0 }
  0x13   : > { %s1415_s30 = scalar_select %p1191_p11, 1, 0 }
  0x14   : > { %p889_p12 = pneg %p1187_p10  ;;  %s164_s6 = sshll.u32 %s1100_s5, 4  ;;  %s165_s6 = int_to_ptr.vmem [resolvable:$true] %s164_s6 }
  0x15   : > { %p963_p0 = scmp.ne.s32.totalorder %s1404_s1, %s962_s10  ;;  %p969_p5 = scmp.lt.u32.totalorder %s962_s10, %s1404_s1 }
  0x16   : > { %p1199_p13 = pnand %p1191_p11, %p889_p12 }
  0x18   : > { %p964_p1 = pneg %p1199_p13 }
  0x1a   : > { %p965_p2 = pnand %p964_p1, %p963_p0 }
  0x1c   : > { %p966_p3 = pneg %p965_p2 }
  0x1e   : > { %p971_p6 = pnand %p969_p5, %p966_p3 }
  0x20   : > { %974 = shalt.err (!%p971_p6)
}
  0x21   : > { %s975_s21 = scalar_lea.vmem %s165_s6, 1024  ;;  %p983_p8 = scmp.lt.s32.totalorder %s165_s6, %s165_s6 }
  0x22   : > { %p976_p7 = scmp.ne.s32.totalorder %s165_s6, %s975_s21  ;;  %p984_p4 = scmp.lt.s32.totalorder %s975_s21, %s975_s21 }
  0x24   : > { %p978_p9 = pnand %p976_p7, %p964_p1  ;;  %p985_p11 = por %p984_p4, %p983_p8 }
  0x26   : > { %p979_p12 = pneg %p978_p9 }
  0x28   : > { %p986_p10 = pnand %p985_p11, %p979_p12 }
  0x2a   : > { %989 = shalt.err (!%p986_p10)
}
  0x2b   : > { %s1101_s22 = smov 64   ;;  %s1102_s24 = smov 4  }
  0x2c   : > { %892 = dma.hbm_to_vmem [thread:$0]  (!%p1199_p13), %s1404_s1, 1024, %s165_s6, [#allocation5], %s1101_s22, %s1101_s22, %s1102_s24  }
  0x2d   : > { %p1417_p0 = scmp.ne.s32.totalorder %s1414_s29, 0 }
  0x2e   : > { %p1418_p2 = scmp.ne.s32.totalorder (!%p1417_p0), %s1415_s30, 0 }
  0x2f   : > { %192 = sbr.rel (%p1417_p0) target bundleno = 373 (0x175), region = 32 }
  0x36   : > { %1067 = dma.done.wait (%p1418_p2), [#allocation5], 1024  }
  0x37   : > { %1069 = vsyncadd (%p1418_p2), [#allocation5], 4294966272  ;;  %s214_s8 = sand.u32 1, %s1082_s16   ;;  %s793_s9 = sshll.u32 %s1090_s18, 11 }
  0x38   : > { %s774_s7 = sshll.u32 %s214_s8, 8  ;;  %s234_s6 = scalar_lea.hbm %s1403_s0, %s793_s9 }
  0x39   : > { %s1103_s12 = smov [#allocation2]   ;;  %s990_s13 = scalar_lea.hbm %s234_s6, 2048 }
  0x3a   : > { %s242_s29 = sshll.u32 %s1103_s12, 4  ;;  %p991_p4 = scmp.ne.s32.totalorder %s234_s6, %s990_s13  ;;  %s243_s29 = int_to_ptr.vmem [resolvable:$true] %s242_s29 }
  0x3b   : > { %s992_s30 = scalar_lea.hbm %s1403_s0, 4096  ;;  %p993_p8 = scmp.lt.u32.totalorder %s234_s6, %s1403_s0 }
  0x3c   : > { %p994_p10 = scmp.lt.u32.totalorder %s992_s30, %s990_s13  ;;  %p996_p13 = scmp.lt.u32.totalorder %s990_s13, %s234_s6 }
  0x3e   : > { %p995_p11 = por %p994_p10, %p993_p8 }
  0x40   : > { %p997_p1 = por %p996_p13, %p995_p11 }
  0x42   : > { %p998_p3 = pnand %p997_p1, %p991_p4 }
  0x44   : > { %1001 = shalt.err (!%p998_p3)  }
  0x45   : > { %s1002_s26 = scalar_lea.vmem %s243_s29, 2048  ;;  %p1007_p6 = scmp.lt.s32.totalorder %s243_s29, %s243_s29 }
  0x46   : > { %p1003_p5 = scmp.ne.s32.totalorder %s243_s29, %s1002_s26  ;;  %p1008_p7 = scmp.lt.s32.totalorder %s1002_s26, %s1002_s26 }
  0x48   : > { %p1009_p9 = por %p1008_p7, %p1007_p6 }
  0x4a   : > { %p1010_p12 = pnand %p1009_p9, %p1003_p5 }
  0x4c   : > { %1013 = shalt.err (!%p1010_p12)  }
  0x4d   : > { %245 = dma.hbm_to_vmem [thread:$0]  %s234_s6, 2048, %s243_s29, [#allocation3] }
  0x4e   : > { %s1238_s5 = scalar_lea.vmem [#allocation7], %s774_s7 }
  0x4f   : > { %1070 = dma.done.wait [#allocation3], 2048 }
  0x50   : > { %1071 = vsyncadd [#allocation3], 4294965248  ;;  %v954_v0 = vld [vmem:[#allocation4] sm:$0xff]   ;;  %v955_v1 = vld [vmem:[#allocation4 + $0x8] sm:$0xff]   ;;  %s794_s6 = sshll.u32 %s1090_s18, 12  ;;  %s652_s12 = sshll.u32 %s1238_s5, 4  ;;  %s1347_s12 = int_to_ptr.vmem [resolvable:$true] %s652_s12 }
  0x51   : > { %819 = vmatprep.subr.bf16.mxu0 %v954_v0  ;;  %867 = vmatprep.subr.bf16.mxu1 %v954_v0  ;;  %v956_v2 = vld [vmem:[#allocation4 + $0x10] sm:$0xff]   ;;  %v957_v3 = vld [vmem:[#allocation4 + $0x18] sm:$0xff]   ;;  %v251_v4 = vld [vmem:[#allocation2] sm:$0xff]  ;;  %s1345_s13 = scalar_lea.hbm %s1407_s4, %s794_s6  ;;  %s1357_s14 = scalar_lea.sflag [#allocation6], %s214_s8 }
  0x52   : > { %820 = vmatpush3.bf16.msra.mxu0 %v954_v0  ;;  %875 = vmatpush3.bf16.msra.mxu1 %v954_v0  ;;  %v259_v5 = vld [vmem:[#allocation2 + $0x40] sm:$0xff]  ;;  %v959_v7 = vld [vmem:[#allocation4 + $0x28] sm:$0xff]   ;;  %v960_v8 = vld [vmem:[#allocation4 + $0x30] sm:$0xff]   ;;  %s1014_s21 = scalar_lea.vmem %s1347_s12, 4096  ;;  %p1419_p2 = scmp.ne.s32.totalorder %s1412_s25, 0 }
  0x53   : > { %821 = vmatprep.subr.bf16.mxu0 %v955_v1  ;;  %868 = vmatprep.subr.bf16.mxu1 %v955_v1  ;;  %v958_v6 = vld [vmem:[#allocation4 + $0x20] sm:$0xff]   ;;  %v961_v9 = vld [vmem:[#allocation4 + $0x38] sm:$0xff]   ;;  %v252_v10 = vld [vmem:[#allocation2 + $0x8] sm:$0xff]  ;;  %p1015_p0 = scmp.ne.s32.totalorder %s1347_s12, %s1014_s21  ;;  %s1104_s30 = smov [#allocation7]  }
  0x54   : > { %835 = vmatprep.mubr.bf16.mxu0 %v251_v4  ;;  %851 = vmatprep.mubr.bf16.mxu1 %v259_v5  ;;  %v260_v11 = vld [vmem:[#allocation2 + $0x48] sm:$0xff]  ;;  %v253_v12 = vld [vmem:[#allocation2 + $0x10] sm:$0xff]  ;;  %v254_v14 = vld [vmem:[#allocation2 + $0x18] sm:$0xff]  ;;  %s1018_s22 = sshll.u32 %s1104_s30, 4  ;;  %s1019_s22 = int_to_ptr.vmem [resolvable:$false] %s1018_s22 }
  0x55   : > { %v261_v13 = vld [vmem:[#allocation2 + $0x50] sm:$0xff]  ;;  %v262_v15 = vld [vmem:[#allocation2 + $0x58] sm:$0xff]  ;;  %v255_v16 = vld [vmem:[#allocation2 + $0x20] sm:$0xff]  ;;  %p1016_p4 = pnand %p1015_p0, %p1419_p2  ;;  %s1020_s24 = scalar_lea.vmem %s1019_s22, 8192 }
  0x56   : > { %822 = vmatpush3.bf16.msra.mxu0 %v955_v1  ;;  %876 = vmatpush3.bf16.msra.mxu1 %v955_v1  ;;  %v263_v17 = vld [vmem:[#allocation2 + $0x60] sm:$0xff]  ;;  %v256_v18 = vld [vmem:[#allocation2 + $0x28] sm:$0xff]  ;;  %v257_v20 = vld [vmem:[#allocation2 + $0x30] sm:$0xff]  ;;  %p1021_p10 = scmp.lt.s32.totalorder %s1347_s12, %s1019_s22  ;;  %p1022_p11 = scmp.lt.s32.totalorder %s1020_s24, %s1014_s21 }
  0x57   : > { %823 = vmatprep.subr.bf16.mxu0 %v956_v2  ;;  %869 = vmatprep.subr.bf16.mxu1 %v956_v2  ;;  %v264_v19 = vld [vmem:[#allocation2 + $0x68] sm:$0xff]  ;;  %v265_v21 = vld [vmem:[#allocation2 + $0x70] sm:$0xff]  ;;  %v258_v22 = vld [vmem:[#allocation2 + $0x38] sm:$0xff]  ;;  %p1017_p8 = pneg %p1016_p4 }
  0x58   : > { %v266_v23 = vld [vmem:[#allocation2 + $0x78] sm:$0xff]  ;;  %v1243_v24 = vld [vmem:[%s1405_s2] ss:$0 sm:$0xff]  ;;  %p1023_p13 = por %p1022_p11, %p1021_p10 }
  0x59   : > { %v1248_v26 = vld [vmem:[%s1406_s3] ss:$0 sm:$0xff] }
  0x5a   : > { %824 = vmatpush3.bf16.msra.mxu0 %v956_v2  ;;  %877 = vmatpush3.bf16.msra.mxu1 %v956_v2  ;;  %p1024_p1 = pnand %p1023_p13, %p1017_p8 }
  0x5b   : > { %825 = vmatprep.subr.bf16.mxu0 %v957_v3  ;;  %870 = vmatprep.subr.bf16.mxu1 %v957_v3 }
  0x5e   : > { %826 = vmatpush3.bf16.msra.mxu0 %v957_v3  ;;  %878 = vmatpush3.bf16.msra.mxu1 %v957_v3 }
  0x5f   : > { %827 = vmatprep.subr.bf16.mxu0 %v958_v6  ;;  %871 = vmatprep.subr.bf16.mxu1 %v958_v6 }
  0x62   : > { %828 = vmatpush3.bf16.msra.mxu0 %v958_v6  ;;  %879 = vmatpush3.bf16.msra.mxu1 %v958_v6 }
  0x63   : > { %829 = vmatprep.subr.bf16.mxu0 %v959_v7  ;;  %872 = vmatprep.subr.bf16.mxu1 %v959_v7 }
  0x66   : > { %830 = vmatpush3.bf16.msra.mxu0 %v959_v7  ;;  %880 = vmatpush3.bf16.msra.mxu1 %v959_v7 }
  0x67   : > { %831 = vmatprep.subr.bf16.mxu0 %v960_v8  ;;  %873 = vmatprep.subr.bf16.mxu1 %v960_v8 }
  0x6a   : > { %832 = vmatpush3.bf16.msra.mxu0 %v960_v8  ;;  %881 = vmatpush3.bf16.msra.mxu1 %v960_v8 }
  0x6b   : > { %833 = vmatprep.subr.bf16.mxu0 %v961_v9  ;;  %874 = vmatprep.subr.bf16.mxu1 %v961_v9 }
  0x6e   : > { %834 = vmatpush3.bf16.msra.mxu0 %v961_v9  ;;  %882 = vmatpush3.bf16.msra.mxu1 %v961_v9 }
  0x71   : > { %836 = vmatmul.mubr.bf16.vlgmr.msra.gmra.mrb[0].mxu0 %v252_v10  ;;  %852 = vmatmul.mubr.bf16.vlgmr.msra.gmra.mrb[0].mxu1 %v260_v11 }
  0x72   : > { %839 = vmatprep.mubr.bf16.mxu0 %v253_v12  ;;  %855 = vmatprep.mubr.bf16.mxu1 %v261_v13 }
  0x79   : > { %840 = vmatmul.mubr.bf16.gmra.mrb[4].mxu0 %v254_v14  ;;  %856 = vmatmul.mubr.bf16.gmra.mrb[4].mxu1 %v262_v15 }
  0x7a   : > { %843 = vmatprep.mubr.bf16.mxu0 %v255_v16  ;;  %859 = vmatprep.mubr.bf16.mxu1 %v263_v17 }
  0x81   : > { %844 = vmatmul.mubr.bf16.gmra.mrb[8].mxu0 %v256_v18  ;;  %860 = vmatmul.mubr.bf16.gmra.mrb[8].mxu1 %v264_v19 }
  0x82   : > { %847 = vmatprep.mubr.bf16.mxu0 %v257_v20  ;;  %863 = vmatprep.mubr.bf16.mxu1 %v265_v21 }
  0x89   : > { %848 = vmatmul.mubr.bf16.gmra.mrb[12].mxu0 %v258_v22  ;;  %864 = vmatmul.mubr.bf16.gmra.mrb[12].mxu1 %v266_v23 }
 0x144   : > { %v837_v25 = vpop.f32.mrb[0].mxu0  ;;  %v853_v27 = vpop.f32.mrb[0].mxu1 }
 0x145   : > { %v501_v28 = vmul.f32 %v837_v25, %v1243_v24  ;;  %v517_v29 = vmul.f32 %v853_v27, %v1243_v24  ;;  %v365_v30 = vpop.f32.mrb[1].mxu0  ;;  %v429_v31 = vpop.f32.mrb[1].mxu1 }
 0x146   : > { %v499_v32 = vmul.f32 %v1243_v24, %v365_v30  ;;  %v515_v33 = vmul.f32 %v1243_v24, %v429_v31  ;;  %v838_v34 = vpop.f32.mrb[2].mxu0  ;;  %v854_v35 = vpop.f32.mrb[2].mxu1 }
 0x147   : > { %v540_v36 = vadd.f32 %v1248_v26, %v501_v28  ;;  %v556_v37 = vadd.f32 %v1248_v26, %v517_v29  ;;  %v502_v38 = vmul.f32 %v838_v34, %v1243_v24  ;;  %v518_v39 = vmul.f32 %v854_v35, %v1243_v24  ;;  %v368_v40 = vpop.f32.mrb[3].mxu0  ;;  %v432_v41 = vpop.f32.mrb[3].mxu1 }
 0x148   : > { %v538_v42 = vadd.f32 %v1248_v26, %v499_v32  ;;  %v554_v43 = vadd.f32 %v1248_v26, %v515_v33  ;;  %v500_v44 = vmul.f32 %v1243_v24, %v368_v40  ;;  %v516_v45 = vmul.f32 %v1243_v24, %v432_v41 }
 0x149   : > { %v572_v46 = vmax.f32 %v540_v36, 0.0  ;;  %v588_v47 = vmax.f32 %v556_v37, 0.0  ;;  %v541_v48 = vadd.f32 %v1248_v26, %v502_v38  ;;  %v557_v49 = vadd.f32 %v1248_v26, %v518_v39 }
 0x14a   : > { %v570_v50 = vmax.f32 %v538_v42, 0.0  ;;  %v586_v51 = vmax.f32 %v554_v43, 0.0  ;;  %v539_v52 = vadd.f32 %v1248_v26, %v500_v44  ;;  %v555_v53 = vadd.f32 %v1248_v26, %v516_v45 }
 0x14b   : > { %604 = vst [vmem:[%s1238_s5 + $0x10] sm:$0xff] %v572_v46  ;;  %620 = vst [vmem:[%s1238_s5 + $0x90] sm:$0xff] %v588_v47  ;;  %v573_v54 = vmax.f32 %v541_v48, 0.0  ;;  %v589_v55 = vmax.f32 %v557_v49, 0.0 }
 0x14c   : > { %602 = vst [vmem:[%s1238_s5] sm:$0xff] %v570_v50  ;;  %618 = vst [vmem:[%s1238_s5 + $0x80] sm:$0xff] %v586_v51  ;;  %v571_v56 = vmax.f32 %v539_v52, 0.0  ;;  %v587_v57 = vmax.f32 %v555_v53, 0.0  ;;  %v841_v58 = vpop.f32.mrb[4].mxu0  ;;  %v857_v59 = vpop.f32.mrb[4].mxu1 }
 0x14d   : > { %605 = vst [vmem:[%s1238_s5 + $0x18] sm:$0xff] %v573_v54  ;;  %621 = vst [vmem:[%s1238_s5 + $0x98] sm:$0xff] %v589_v55  ;;  %v505_v60 = vmul.f32 %v841_v58, %v1243_v24  ;;  %v521_v61 = vmul.f32 %v857_v59, %v1243_v24  ;;  %v381_v62 = vpop.f32.mrb[5].mxu0  ;;  %v445_v63 = vpop.f32.mrb[5].mxu1 }
 0x14e   : > { %603 = vst [vmem:[%s1238_s5 + $0x8] sm:$0xff] %v571_v56  ;;  %619 = vst [vmem:[%s1238_s5 + $0x88] sm:$0xff] %v587_v57  ;;  %v503_v0 = vmul.f32 %v1243_v24, %v381_v62  ;;  %v519_v1 = vmul.f32 %v1243_v24, %v445_v63  ;;  %v842_v2 = vpop.f32.mrb[6].mxu0  ;;  %v858_v3 = vpop.f32.mrb[6].mxu1 }
 0x14f   : > { %v544_v4 = vadd.f32 %v1248_v26, %v505_v60  ;;  %v560_v5 = vadd.f32 %v1248_v26, %v521_v61  ;;  %v506_v6 = vmul.f32 %v842_v2, %v1243_v24  ;;  %v522_v7 = vmul.f32 %v858_v3, %v1243_v24  ;;  %v384_v8 = vpop.f32.mrb[7].mxu0  ;;  %v448_v9 = vpop.f32.mrb[7].mxu1 }
 0x150   : > { %v542_v10 = vadd.f32 %v1248_v26, %v503_v0  ;;  %v558_v11 = vadd.f32 %v1248_v26, %v519_v1  ;;  %v504_v12 = vmul.f32 %v1243_v24, %v384_v8  ;;  %v520_v13 = vmul.f32 %v1243_v24, %v448_v9 }
 0x151   : > { %v576_v14 = vmax.f32 %v544_v4, 0.0  ;;  %v592_v15 = vmax.f32 %v560_v5, 0.0  ;;  %v545_v16 = vadd.f32 %v1248_v26, %v506_v6  ;;  %v561_v17 = vadd.f32 %v1248_v26, %v522_v7 }
 0x152   : > { %v574_v18 = vmax.f32 %v542_v10, 0.0  ;;  %v590_v19 = vmax.f32 %v558_v11, 0.0  ;;  %v543_v20 = vadd.f32 %v1248_v26, %v504_v12  ;;  %v559_v21 = vadd.f32 %v1248_v26, %v520_v13 }
 0x153   : > { %608 = vst [vmem:[%s1238_s5 + $0x30] sm:$0xff] %v576_v14  ;;  %624 = vst [vmem:[%s1238_s5 + $0xb0] sm:$0xff] %v592_v15  ;;  %v577_v22 = vmax.f32 %v545_v16, 0.0  ;;  %v593_v23 = vmax.f32 %v561_v17, 0.0 }
 0x154   : > { %606 = vst [vmem:[%s1238_s5 + $0x20] sm:$0xff] %v574_v18  ;;  %622 = vst [vmem:[%s1238_s5 + $0xa0] sm:$0xff] %v590_v19  ;;  %v575_v25 = vmax.f32 %v543_v20, 0.0  ;;  %v591_v27 = vmax.f32 %v559_v21, 0.0  ;;  %v845_v28 = vpop.f32.mrb[8].mxu0  ;;  %v861_v29 = vpop.f32.mrb[8].mxu1 }
 0x155   : > { %609 = vst [vmem:[%s1238_s5 + $0x38] sm:$0xff] %v577_v22  ;;  %625 = vst [vmem:[%s1238_s5 + $0xb8] sm:$0xff] %v593_v23  ;;  %v509_v30 = vmul.f32 %v845_v28, %v1243_v24  ;;  %v525_v31 = vmul.f32 %v861_v29, %v1243_v24  ;;  %v397_v32 = vpop.f32.mrb[9].mxu0  ;;  %v461_v33 = vpop.f32.mrb[9].mxu1 }
 0x156   : > { %607 = vst [vmem:[%s1238_s5 + $0x28] sm:$0xff] %v575_v25  ;;  %623 = vst [vmem:[%s1238_s5 + $0xa8] sm:$0xff] %v591_v27  ;;  %v507_v34 = vmul.f32 %v1243_v24, %v397_v32  ;;  %v523_v35 = vmul.f32 %v1243_v24, %v461_v33  ;;  %v846_v36 = vpop.f32.mrb[10].mxu0  ;;  %v862_v37 = vpop.f32.mrb[10].mxu1 }
 0x157   : > { %v548_v38 = vadd.f32 %v1248_v26, %v509_v30  ;;  %v564_v39 = vadd.f32 %v1248_v26, %v525_v31  ;;  %v510_v40 = vmul.f32 %v846_v36, %v1243_v24  ;;  %v526_v41 = vmul.f32 %v862_v37, %v1243_v24  ;;  %v400_v42 = vpop.f32.mrb[11].mxu0  ;;  %v464_v43 = vpop.f32.mrb[11].mxu1 }
 0x158   : > { %v546_v44 = vadd.f32 %v1248_v26, %v507_v34  ;;  %v562_v45 = vadd.f32 %v1248_v26, %v523_v35  ;;  %v508_v46 = vmul.f32 %v1243_v24, %v400_v42  ;;  %v524_v47 = vmul.f32 %v1243_v24, %v464_v43 }
 0x159   : > { %v580_v48 = vmax.f32 %v548_v38, 0.0  ;;  %v596_v49 = vmax.f32 %v564_v39, 0.0  ;;  %v549_v50 = vadd.f32 %v1248_v26, %v510_v40  ;;  %v565_v51 = vadd.f32 %v1248_v26, %v526_v41 }
 0x15a   : > { %v578_v52 = vmax.f32 %v546_v44, 0.0  ;;  %v594_v53 = vmax.f32 %v562_v45, 0.0  ;;  %v547_v54 = vadd.f32 %v1248_v26, %v508_v46  ;;  %v563_v55 = vadd.f32 %v1248_v26, %v524_v47 }
 0x15b   : > { %612 = vst [vmem:[%s1238_s5 + $0x50] sm:$0xff] %v580_v48  ;;  %628 = vst [vmem:[%s1238_s5 + $0xd0] sm:$0xff] %v596_v49  ;;  %v581_v56 = vmax.f32 %v549_v50, 0.0  ;;  %v597_v57 = vmax.f32 %v565_v51, 0.0 }
 0x15c   : > { %610 = vst [vmem:[%s1238_s5 + $0x40] sm:$0xff] %v578_v52  ;;  %626 = vst [vmem:[%s1238_s5 + $0xc0] sm:$0xff] %v594_v53  ;;  %v579_v58 = vmax.f32 %v547_v54, 0.0  ;;  %v595_v59 = vmax.f32 %v563_v55, 0.0  ;;  %v849_v60 = vpop.f32.mrb[12].mxu0  ;;  %v865_v61 = vpop.f32.mrb[12].mxu1 }
 0x15d   : > { %613 = vst [vmem:[%s1238_s5 + $0x58] sm:$0xff] %v581_v56  ;;  %629 = vst [vmem:[%s1238_s5 + $0xd8] sm:$0xff] %v597_v57  ;;  %v513_v62 = vmul.f32 %v849_v60, %v1243_v24  ;;  %v529_v63 = vmul.f32 %v865_v61, %v1243_v24  ;;  %v413_v0 = vpop.f32.mrb[13].mxu0  ;;  %v477_v1 = vpop.f32.mrb[13].mxu1 }
 0x15e   : > { %611 = vst [vmem:[%s1238_s5 + $0x48] sm:$0xff] %v579_v58  ;;  %627 = vst [vmem:[%s1238_s5 + $0xc8] sm:$0xff] %v595_v59  ;;  %v511_v2 = vmul.f32 %v1243_v24, %v413_v0  ;;  %v527_v3 = vmul.f32 %v1243_v24, %v477_v1  ;;  %v850_v4 = vpop.f32.mrb[14].mxu0  ;;  %v866_v5 = vpop.f32.mrb[14].mxu1 }
 0x15f   : > { %v552_v6 = vadd.f32 %v1248_v26, %v513_v62  ;;  %v568_v7 = vadd.f32 %v1248_v26, %v529_v63  ;;  %v514_v8 = vmul.f32 %v850_v4, %v1243_v24  ;;  %v530_v9 = vmul.f32 %v866_v5, %v1243_v24  ;;  %v416_v10 = vpop.f32.mrb[15].mxu0  ;;  %v480_v11 = vpop.f32.mrb[15].mxu1 }
 0x160   : > { %v550_v12 = vadd.f32 %v1248_v26, %v511_v2  ;;  %v566_v13 = vadd.f32 %v1248_v26, %v527_v3  ;;  %v512_v14 = vmul.f32 %v1243_v24, %v416_v10  ;;  %v528_v15 = vmul.f32 %v1243_v24, %v480_v11 }
 0x161   : > { %v584_v16 = vmax.f32 %v552_v6, 0.0  ;;  %v600_v17 = vmax.f32 %v568_v7, 0.0  ;;  %v553_v18 = vadd.f32 %v1248_v26, %v514_v8  ;;  %v569_v19 = vadd.f32 %v1248_v26, %v530_v9 }
 0x162   : > { %v582_v20 = vmax.f32 %v550_v12, 0.0  ;;  %v598_v21 = vmax.f32 %v566_v13, 0.0  ;;  %v551_v22 = vadd.f32 %v1248_v26, %v512_v14  ;;  %v567_v24 = vadd.f32 %v1248_v26, %v528_v15 }
 0x163   : > { %616 = vst [vmem:[%s1238_s5 + $0x70] sm:$0xff] %v584_v16  ;;  %632 = vst [vmem:[%s1238_s5 + $0xf0] sm:$0xff] %v600_v17  ;;  %v585_v23 = vmax.f32 %v553_v18, 0.0  ;;  %v601_v25 = vmax.f32 %v569_v19, 0.0 }
 0x164   : > { %614 = vst [vmem:[%s1238_s5 + $0x60] sm:$0xff] %v582_v20  ;;  %630 = vst [vmem:[%s1238_s5 + $0xe0] sm:$0xff] %v598_v21  ;;  %v583_v27 = vmax.f32 %v551_v22, 0.0  ;;  %v599_v28 = vmax.f32 %v567_v24, 0.0 }
 0x165   : > { %617 = vst [vmem:[%s1238_s5 + $0x78] sm:$0xff] %v585_v23  ;;  %633 = vst [vmem:[%s1238_s5 + $0xf8] sm:$0xff] %v601_v25 }
 0x166   : > { %615 = vst [vmem:[%s1238_s5 + $0x68] sm:$0xff] %v583_v27  ;;  %631 = vst [vmem:[%s1238_s5 + $0xe8] sm:$0xff] %v599_v28 }
 0x167   : > { %1027 = shalt.err (!%p1024_p1)
}
 0x168   : > { %s1028_s8 = scalar_lea.hbm %s1345_s13, 4096  ;;  %s1032_s9 = scalar_lea.hbm %s1407_s4, 8192 }
 0x169   : > { %p1029_p3 = scmp.ne.s32.totalorder %s1345_s13, %s1028_s8  ;;  %p1033_p7 = scmp.lt.u32.totalorder %s1345_s13, %s1407_s4 }
 0x16a   : > { %p1034_p9 = scmp.lt.u32.totalorder %s1032_s9, %s1028_s8  ;;  %p1036_p0 = scmp.lt.u32.totalorder %s1028_s8, %s1345_s13 }
 0x16b   : > { %p1030_p5 = pnand %p1029_p3, %p1419_p2 }
 0x16c   : > { %p1035_p12 = por %p1034_p9, %p1033_p7 }
 0x16d   : > { %p1031_p6 = pneg %p1030_p5 }
 0x16e   : > { %p1037_p4 = por %p1036_p0, %p1035_p12 }
 0x170   : > { %p1038_p8 = pnand %p1037_p4, %p1031_p6 }
 0x172   : > { %1041 = shalt.err (!%p1038_p8)
}
 0x173   : > { %s1105_s11 = smov 128   ;;  %s1106_s6 = smov 8  }
 0x174   : > { %887 = dma.vmem_to_hbm [thread:$0]  (%p1419_p2), %s1347_s12, 4096, %s1345_s13, %s1357_s14, %s1105_s11, %s1105_s11, %s1106_s6  }
 0x175 PF: > { %p899_p10 = scmp.ge.s32.totalorder %s1098_s20, 2  ;;  %s667_s18 = sand.u32 1, %s1078_s15  }
 0x176   : > { %p1420_p11 = scmp.ne.s32.totalorder %s1413_s27, 0  ;;  %s668_s29 = scalar_lea.sflag [#allocation6], %s667_s18 }
 0x178   : > { %p894_p13 = pnand %p899_p10, %p1420_p11 }
 0x17a   : > { %1073 = dma.done.wait (!%p894_p13), %s668_s29, 4096  }
 0x17b   : > { %1075 = vsyncadd (!%p894_p13), %s668_s29, 4294963200  ;;  %s18_s20 = sadd.s32 1, %s1098_s20   ;;  %s1421_s15 = smov %s1082_s16 }
 0x17c   : > { %p15_p1 = scmp.ge.s32.totalorder %s18_s20, 4   ;;  %s1422_s16 = smov %s1086_s17 }
 0x17d   : > { %s1423_s17 = smov %s1185_s28  ;;  %s1424_s18 = smov %s1094_s19 }
 0x17e   : > { %s1425_s19 = smov %s1427_s23  ;;  %17 = sbr.rel (!%p15_p1) target bundleno = 5 (0x5), region = 85 }
 0x185   :  { %673 = vsyncpa [#allocation5], 1 }
 0x186   :  { %675 = vsyncpa [#allocation5 + $0x1], 1 }
 0x187   :  { %676 = vsyncpa [#allocation6], 1 }
 0x188   :  { %678 = vsyncpa [#allocation6 + $0x1], 1 }
 0x189   :  { %679 = vsyncmov [#allocation3] }
 0x18c   :  { %s680_s25 = vpop.sfrf %679 }
 0x18d   :  { %p792_p2 = scmp.ne.s32.totalorder %s680_s25, 0 }
 0x18f   :  { %684 = shalt.err (%p792_p2)  }

</bundles_post_ra>
